<compile_context>
chip_gen: v5e
topology: v5e:2x2
jax: 0.10.0
libtpu: 0.0.40
codegen_flags: <defaults>
</compile_context>

<pallas_src>
import math

import jax
import jax.numpy as jnp
from jax.experimental import pallas as pl
from jax.experimental.pallas import tpu as pltpu


_HALF_LOG_2PI = 0.5 * math.log(2.0 * math.pi)
_VMEM_BUDGET = 40 * 2**20     # conservative working-set budget (fits v7x's 64 MiB VMEM)
_VMEM_LIMIT = 48 * 2**20      # scoped-VMEM limit passed to Mosaic (> 32 MiB default)


# --------------------------------------------------------------------------
# In-kernel special functions (float32, positive arguments only).
# --------------------------------------------------------------------------
def _softplus(x):
    """Matches torch.nn.Softplus(beta=1, threshold=20)."""
    return jnp.where(x > 20.0, x, jnp.log1p(jnp.exp(jnp.minimum(x, 20.0))))


def _lgamma_digamma(x):
    """(lgamma(x), digamma(x)) for x > 0, in f32.

    Rational form per the review: shift-by-6 recurrence (one log + one divide instead of
    the old 8-term partial-fraction Lanczos sum and 6 reciprocal shifts) followed by the
    Stirling / asymptotic series at y >= 6.  y, 1/y and log(y) are shared between the two
    functions, so the pair costs ~4 EUP ops per element.  For x > 8 the shift is skipped
    (select), which also avoids overflow of the shift product for very large x.
    """
    big = x > 8.0
    # p = x(x+1)...(x+5);  sum_{k=0..5} 1/(x+k) = p'(x)/p(x)  (single divide).
    p = x * (x + 1.0) * (x + 2.0) * (x + 3.0) * (x + 4.0) * (x + 5.0)
    dprime = ((((6.0 * x + 75.0) * x + 340.0) * x + 675.0) * x + 548.0) * x + 120.0
    y = jnp.where(big, x, x + 6.0)
    inv_y = 1.0 / y
    log_y = jnp.log(y)
    w = inv_y * inv_y
    lg_tail = inv_y * (1.0 / 12.0
                       - w * (1.0 / 360.0 - w * (1.0 / 1260.0 - w * (1.0 / 1680.0))))
    lgamma_y = (y - 0.5) * log_y - y + _HALF_LOG_2PI + lg_tail
    digamma_y = log_y - 0.5 * inv_y - w * (1.0 / 12.0
                                           - w * (1.0 / 120.0 - w * (1.0 / 252.0)))
    lgamma_x = lgamma_y - jnp.where(big, 0.0, jnp.log(p))
    digamma_x = digamma_y - jnp.where(big, 0.0, dprime / p)
    return lgamma_x, digamma_x


def _kl_gamma_vs_target(p_conc, p_rate, q_conc, q_rate, q_const):
    """KL(Gamma(p_conc, p_rate) || Gamma(q_conc, q_rate)), elementwise.

    q_const = lgamma(q_conc) - q_conc * log(q_rate) is precomputed in the wrapper
    (target-side transcendentals hoisted out of the kernel).  Divides are exact
    (review parity concern about approx reciprocals).
    """
    lg, dg = _lgamma_digamma(p_conc)
    t13 = q_conc * jnp.log(p_rate) + q_const - lg
    t3 = (p_conc - q_conc) * dg
    t4 = (q_rate - p_rate) * (p_conc / p_rate)
    return t13 + t3 + t4


# --------------------------------------------------------------------------
# Batch padding / lane-tile planning (replaces the old tb=8 divisor fallback).
# --------------------------------------------------------------------------
def _pad_batch(batch):
    """Lane-aligned padded batch: small batches keep a single full-width tile."""
    return batch if batch < 256 else pl.cdiv(batch, 128) * 128


def _pick_tile(padded, fixed_bytes, per_lane_bytes, budget=_VMEM_BUDGET):
    """Largest lane tile that (a) is a multiple of 128, (b) divides the padded batch,
    (c) fits the VMEM budget next to the resident weights, and (d) when possible leaves
    >= 2 grid steps so the 'parallel' axis can shard across v7x's two TensorCores."""
    if padded < 256:
        return padded
    avail = max(budget - fixed_bytes, 128 * per_lane_bytes)
    tiles = [t for t in (512, 384, 256, 128)
             if padded % t == 0 and t * per_lane_bytes <= avail] or [128]
    for t in tiles:
        if padded // t >= 2:
            return t
    return tiles[-1]


def _encode_vmem_estimate(data, hidden, latent):
    sub = lambda v: pl.cdiv(v, 8) * 8
    lane = lambda v: pl.cdiv(v, 128) * 128
    # Resident (constant index-map) inputs; BlockSpec still double-buffers them.
    fixed = 2 * (sub(hidden) * lane(data) * 2           # W1^T   bf16
                 + sub(2 * latent) * lane(hidden) * 2   # W2^T   bf16
                 + sub(hidden + 5 * latent) * 128 * 4)  # packed consts f32
    # Per lane column of a batch tile (double-buffered IO + rough live temporaries).
    per_lane = (2 * sub(data) * 2                       # x^T block bf16
                + 2 * 2 * sub(latent) * 4 + 2 * 8 * 4   # loc/scale/scores outputs
                + (sub(hidden) + 14 * sub(latent)) * 4)
    return fixed, per_lane


def _zscore_vmem_estimate(n, latent):
    sub = lambda v: pl.cdiv(v, 8) * 8
    fixed = 2 * sub(3 * latent) * 128 * 4
    per_lane = 2 * n * sub(latent) * 4 + 2 * 8 * 4 + (2 * n + 10) * sub(latent) * 4
    return fixed, per_lane


# --------------------------------------------------------------------------
# Kernel 1: inference network + softplus + KL(Gamma(loc,scale) || target).
# Feature-major: batch on lanes, latent/hidden on sublanes.
# --------------------------------------------------------------------------
def _encoder_kernel(xT_ref, w1T_ref, w2T_ref, c_ref, locT_ref, scaleT_ref, scoresT_ref):
    latent = locT_ref.shape[0]
    hidden = w1T_ref.shape[0]

    # Packed per-feature constants: [b1 | b2 | q_conc | q_rate | q_const], column layout.
    c = c_ref[...]                                  # (hidden + 5*latent, 1)
    b1 = c[0:hidden]
    b2 = c[hidden:hidden + 2 * latent]
    off = hidden + 2 * latent
    q_conc = c[off:off + latent]
    q_rate = c[off + latent:off + 2 * latent]
    q_const = c[off + 2 * latent:off + 3 * latent]

    # Layer 1: (hidden, data) @ (data, tb) on the MXU, bf16 in / f32 accumulate.
    h = jnp.dot(w1T_ref[...], xT_ref[...], preferred_element_type=jnp.float32) + b1
    h = jnp.maximum(h, 0.0).astype(jnp.bfloat16)
    # Layer 2: loc|scale heads fused into a single (2*latent, hidden) @ (hidden, tb) push;
    # the split below is a cheap sublane slice of the f32 result.
    y = jnp.dot(w2T_ref[...], h, preferred_element_type=jnp.float32) + b2

    # Softplus heads; clamp away exact-zero underflow so lgamma/digamma stay finite
    # (robustness over bit-parity with torch, which would emit inf here).
    loc = jnp.maximum(_softplus(y[0:latent]), 1e-30)
    scale = jnp.maximum(_softplus(y[latent:2 * latent]), 1e-30)
    locT_ref[...] = loc
    scaleT_ref[...] = scale

    kl = _kl_gamma_vs_target(loc, scale, q_conc, q_rate, q_const)
    # mean over latent == torch .mean(dim=-1): sublane reduce -> lane-dense (1, tb) slab.
    scoresT_ref[...] = jnp.sum(kl, axis=0, keepdims=True) * (1.0 / latent)


def encode(x, w1, b1, w2, b2, q_conc, q_rate, q_const):
    """Returns loc, scale as (latent, padded_batch) feature-major slabs and the KL score
    as a lane-dense (1, padded_batch) slab."""
    batch, data = x.shape
    hidden = w1.shape[-1]
    latent = q_conc.shape[-1]

    fixed, per_lane = _encode_vmem_estimate(data, hidden, latent)
    padded = _pad_batch(batch)
    tb = _pick_tile(padded, fixed, per_lane)

    # Wrapper-side layout plumbing (fused by XLA with the bf16 cast / pad):
    xT = x.T.astype(jnp.bfloat16)                       # (data, batch)
    if padded != batch:
        xT = jnp.pad(xT, ((0, 0), (0, padded - batch)))
    w1T = w1.T.astype(jnp.bfloat16)                     # (hidden, data)
    w2T = w2.T.astype(jnp.bfloat16)                     # (2*latent, hidden), loc rows first
    consts = jnp.concatenate(
        [b1.reshape(hidden, 1), b2.reshape(2 * latent, 1),
         q_conc.reshape(latent, 1), q_rate.reshape(latent, 1),
         q_const.reshape(latent, 1)], axis=0).astype(jnp.float32)

    rep = lambda i: (0, 0)      # resident weights / constants (constant index map)
    col = lambda i: (0, i)      # batch-lane tiled arrays
    # NOTE: the resident specs are still double-buffered by BlockSpec; for very large
    # data/hidden on v7x, pipeline_mode=pl.Buffered(1) on the weight specs would reclaim
    # one copy's worth of VMEM.
    return pl.pallas_call(
        _encoder_kernel,
        out_shape=(jax.ShapeDtypeStruct((latent, padded), jnp.float32),
                   jax.ShapeDtypeStruct((latent, padded), jnp.float32),
                   jax.ShapeDtypeStruct((1, padded), jnp.float32)),
        grid=(padded // tb,),
        in_specs=[
            pl.BlockSpec((data, tb), col),
            pl.BlockSpec((hidden, data), rep),
            pl.BlockSpec((2 * latent, hidden), rep),
            pl.BlockSpec((hidden + 5 * latent, 1), rep),
        ],
        out_specs=(pl.BlockSpec((latent, tb), col),
                   pl.BlockSpec((latent, tb), col),
                   pl.BlockSpec((1, tb), col)),
        compiler_params=pltpu.CompilerParams(
            dimension_semantics=("parallel",),          # shard batch tiles on v7x megacore
            vmem_limit_bytes=_VMEM_LIMIT),
    )(xT, w1T, w2T, consts)


# --------------------------------------------------------------------------
# Kernel 2: moment matching + KL(Gamma(alpha,beta) || target).
# z arrives already feature-major: (n_samples, latent, padded_batch).
# --------------------------------------------------------------------------
def _zscore_kernel(z_ref, c_ref, out_ref):
    n, latent, _ = z_ref.shape
    c = c_ref[...]                                   # (3*latent, 1)
    q_conc = c[0:latent]
    q_rate = c[latent:2 * latent]
    q_const = c[2 * latent:3 * latent]

    z = z_ref[...]                                   # (n, latent, tb), VMEM resident
    mz = jnp.sum(z, axis=0) * (1.0 / n)              # torch .mean(dim=0)
    d = z - mz[None]                                 # two-pass, centered: no cancellation
    ms = jnp.sum(d * d, axis=0) * (1.0 / (n - 1))    # torch .var(dim=0), unbiased
    ms = jnp.maximum(ms, 1e-30)                      # guard zero variance -> finite KL
    beta = mz / ms
    alpha = mz * beta
    kl = _kl_gamma_vs_target(alpha, beta, q_conc, q_rate, q_const)
    out_ref[...] = jnp.sum(kl, axis=0, keepdims=True) * (1.0 / latent)


def z_score_fn(z_feat, q_conc, q_rate, q_const):
    """z_feat: (n_samples, latent, padded_batch).  Returns (1, padded_batch) scores."""
    n, latent, padded = z_feat.shape
    fixed, per_lane = _zscore_vmem_estimate(n, latent)
    tb = _pick_tile(padded, fixed, per_lane)

    consts = jnp.concatenate(
        [q_conc.reshape(latent, 1), q_rate.reshape(latent, 1),
         q_const.reshape(latent, 1)], axis=0).astype(jnp.float32)

    return pl.pallas_call(
        _zscore_kernel,
        out_shape=jax.ShapeDtypeStruct((1, padded), jnp.float32),
        grid=(padded // tb,),
        in_specs=[
            pl.BlockSpec((n, latent, tb), lambda i: (0, 0, i)),
            pl.BlockSpec((3 * latent, 1), lambda i: (0, 0)),
        ],
        out_specs=pl.BlockSpec((1, tb), lambda i: (0, i)),
        compiler_params=pltpu.CompilerParams(
            dimension_semantics=("parallel",),
            vmem_limit_bytes=_VMEM_LIMIT),
    )(z_feat, consts)


# --------------------------------------------------------------------------
# Full forward pass (glue in plain JAX).
# --------------------------------------------------------------------------
def encoder_gamma_forward(x, params, target_conc, target_rate, n_samples, key):
    w1, b1, w2, b2 = params
    batch = x.shape[0]
    # Target-side KL constants hoisted out of both kernels (exact lgamma here).
    klc = jax.lax.lgamma(target_conc) - target_conc * jnp.log(target_rate)

    locT, scaleT, scoresT = encode(x, w1, b1, w2, b2, target_conc, target_rate, klc)

    # TODO(synk): Gamma rejection sampling has no clean in-kernel Pallas equivalent;
    # sampling stays in jax.random.gamma (rate applied by division).  Sampling directly
    # in the feature-major (n, latent, padded_batch) layout feeds kernel 2 with zero
    # transpose of the big sample tensor; only the returned zrnd view is transposed.
    z_feat = jax.random.gamma(key, locT, shape=(n_samples,) + locT.shape) / scaleT

    zsT = z_score_fn(z_feat, target_conc, target_rate, klc)

    zrnd = jnp.transpose(z_feat[:, :, :batch], (0, 2, 1))    # (n, batch, latent)
    scores = scoresT[0, :batch].reshape(batch, 1)
    z_score = zsT[0, :batch].reshape(batch, 1)
    return zrnd, scores, z_score


if __name__ == "__main__":
    # Small shapes consistent with the module: batch=8, data_size=16,
    # latent_size=8 (hidden = 2*latent = 16), n_samples=4.
    B, D, L, N = 8, 16, 8, 4
    H = 2 * L

    key = jax.random.PRNGKey(0)
    kx, kw1, kw2, kb1, kb2, ksample = jax.random.split(key, 6)

    x = jax.random.normal(kx, (B, D), jnp.float32)
    w1 = jax.random.normal(kw1, (D, H), jnp.float32) * (1.0 / math.sqrt(D))
    b1 = (jax.random.uniform(kb1, (1, H), jnp.float32) - 0.5) * 0.1
    w2 = jax.random.normal(kw2, (H, 2 * L), jnp.float32) * (1.0 / math.sqrt(H))
    b2 = (jax.random.uniform(kb2, (1, 2 * L), jnp.float32) - 0.5) * 0.1

    # target_function: Gamma(concentration=1, rate=1) per latent dim
    # (consistent with self._gamm_alpha = 1.0).
    target_conc = jnp.ones((1, L), jnp.float32)
    target_rate = jnp.ones((1, L), jnp.float32)

    zrnd, scores, zscore = encoder_gamma_forward(
        x, (w1, b1, w2, b2), target_conc, target_rate, N, ksample)

    jax.block_until_ready((zrnd, scores, zscore))
    assert zrnd.shape == (N, B, L)
    assert scores.shape == (B, 1)
    assert zscore.shape == (B, 1)
    assert bool(jnp.all(jnp.isfinite(scores))) and bool(jnp.all(jnp.isfinite(zscore)))
    print("KERNEL_OK")
</pallas_src>

<mosaic_0001>
module attributes {stable_mosaic.version = 11 : i64} {
  func.func @_encoder_kernel(%arg0: i32, %arg1: memref<16x8xbf16, #tpu.memory_space<vmem>>, %arg2: memref<16x16xbf16, #tpu.memory_space<vmem>>, %arg3: memref<16x16xbf16, #tpu.memory_space<vmem>>, %arg4: memref<56x1xf32, #tpu.memory_space<vmem>>, %arg5: memref<8x8xf32, #tpu.memory_space<vmem>>, %arg6: memref<8x8xf32, #tpu.memory_space<vmem>>, %arg7: memref<1x8xf32, #tpu.memory_space<vmem>>) attributes {dimension_semantics = [#tpu.dimension_semantics<parallel>], iteration_bounds = array<i64: 1>, scalar_prefetch = 0 : i64, scratch_operands = 0 : i64, tpu.core_type = #tpu.core_type<tc>, window_params = [{transform_indices = @transform_0, window_bounds = array<i64: 16, 8>}, {pipeline_mode = #tpu.pipeline_mode<synchronous>, transform_indices = @transform_1, window_bounds = array<i64: 16, 16>}, {pipeline_mode = #tpu.pipeline_mode<synchronous>, transform_indices = @transform_2, window_bounds = array<i64: 16, 16>}, {pipeline_mode = #tpu.pipeline_mode<synchronous>, transform_indices = @transform_3, window_bounds = array<i64: 56, 1>}, {transform_indices = @transform_4, window_bounds = array<i64: 8, 8>}, {transform_indices = @transform_5, window_bounds = array<i64: 8, 8>}, {transform_indices = @transform_6, window_bounds = array<i64: 1, 8>}]} {
    %c0 = arith.constant 0 : index
    %c0_0 = arith.constant 0 : index
    %0 = vector.load %arg4[%c0, %c0_0] : memref<56x1xf32, #tpu.memory_space<vmem>>, vector<56x1xf32>
    %1 = vector.extract_strided_slice %0 {offsets = [0, 0], sizes = [16, 1], strides = [1, 1]} : vector<56x1xf32> to vector<16x1xf32>
    %2 = vector.extract_strided_slice %0 {offsets = [16, 0], sizes = [16, 1], strides = [1, 1]} : vector<56x1xf32> to vector<16x1xf32>
    %3 = vector.extract_strided_slice %0 {offsets = [32, 0], sizes = [8, 1], strides = [1, 1]} : vector<56x1xf32> to vector<8x1xf32>
    %4 = vector.extract_strided_slice %0 {offsets = [40, 0], sizes = [8, 1], strides = [1, 1]} : vector<56x1xf32> to vector<8x1xf32>
    %5 = vector.extract_strided_slice %0 {offsets = [48, 0], sizes = [8, 1], strides = [1, 1]} : vector<56x1xf32> to vector<8x1xf32>
    %c0_1 = arith.constant 0 : index
    %c0_2 = arith.constant 0 : index
    %6 = vector.load %arg2[%c0_1, %c0_2] : memref<16x16xbf16, #tpu.memory_space<vmem>>, vector<16x16xbf16>
    %c0_3 = arith.constant 0 : index
    %c0_4 = arith.constant 0 : index
    %7 = vector.load %arg1[%c0_3, %c0_4] : memref<16x8xbf16, #tpu.memory_space<vmem>>, vector<16x8xbf16>
    %cst = arith.constant dense<0.000000e+00> : vector<16x8xf32>
    %8 = tpu.matmul %6, %7, %cst {dimension_numbers = #tpu.dot_dimension_numbers<[1], [0], [0], [1], [0, 0, 1, 1], [], []>} : vector<16x16xbf16>, vector<16x8xbf16>, vector<16x8xf32> -> vector<16x8xf32>
    %9 = vector.broadcast %1 : vector<16x1xf32> to vector<16x8xf32>
    %10 = arith.addf %8, %9 : vector<16x8xf32>
    %cst_5 = arith.constant 0.000000e+00 : f32
    %11 = vector.broadcast %cst_5 : f32 to vector<16x8xf32>
    %12 = arith.maximumf %10, %11 : vector<16x8xf32>
    %13 = arith.truncf %12 : vector<16x8xf32> to vector<16x8xbf16>
    %c0_6 = arith.constant 0 : index
    %c0_7 = arith.constant 0 : index
    %14 = vector.load %arg3[%c0_6, %c0_7] : memref<16x16xbf16, #tpu.memory_space<vmem>>, vector<16x16xbf16>
    %cst_8 = arith.constant dense<0.000000e+00> : vector<16x8xf32>
    %15 = tpu.matmul %14, %13, %cst_8 {dimension_numbers = #tpu.dot_dimension_numbers<[1], [0], [0], [1], [0, 0, 1, 1], [], []>} : vector<16x16xbf16>, vector<16x8xbf16>, vector<16x8xf32> -> vector<16x8xf32>
    %16 = vector.broadcast %2 : vector<16x1xf32> to vector<16x8xf32>
    %17 = arith.addf %15, %16 : vector<16x8xf32>
    %18 = vector.extract_strided_slice %17 {offsets = [0, 0], sizes = [8, 8], strides = [1, 1]} : vector<16x8xf32> to vector<8x8xf32>
    %cst_9 = arith.constant 2.000000e+01 : f32
    %19 = vector.broadcast %cst_9 : f32 to vector<8x8xf32>
    %20 = arith.cmpf ogt, %18, %19 : vector<8x8xf32>
    %cst_10 = arith.constant 2.000000e+01 : f32
    %21 = vector.broadcast %cst_10 : f32 to vector<8x8xf32>
    %22 = arith.minimumf %18, %21 : vector<8x8xf32>
    %23 = math.exp %22 : vector<8x8xf32>
    %24 = math.log1p %23 : vector<8x8xf32>
    %25 = arith.select %20, %18, %24 : vector<8x8xi1>, vector<8x8xf32>
    %cst_11 = arith.constant 1.000000e-30 : f32
    %26 = vector.broadcast %cst_11 : f32 to vector<8x8xf32>
    %27 = arith.maximumf %25, %26 : vector<8x8xf32>
    %28 = vector.extract_strided_slice %17 {offsets = [8, 0], sizes = [8, 8], strides = [1, 1]} : vector<16x8xf32> to vector<8x8xf32>
    %cst_12 = arith.constant 2.000000e+01 : f32
    %29 = vector.broadcast %cst_12 : f32 to vector<8x8xf32>
    %30 = arith.cmpf ogt, %28, %29 : vector<8x8xf32>
    %cst_13 = arith.constant 2.000000e+01 : f32
    %31 = vector.broadcast %cst_13 : f32 to vector<8x8xf32>
    %32 = arith.minimumf %28, %31 : vector<8x8xf32>
    %33 = math.exp %32 : vector<8x8xf32>
    %34 = math.log1p %33 : vector<8x8xf32>
    %35 = arith.select %30, %28, %34 : vector<8x8xi1>, vector<8x8xf32>
    %cst_14 = arith.constant 1.000000e-30 : f32
    %36 = vector.broadcast %cst_14 : f32 to vector<8x8xf32>
    %37 = arith.maximumf %35, %36 : vector<8x8xf32>
    %c0_15 = arith.constant 0 : index
    %c0_16 = arith.constant 0 : index
    %38 = vector.load %arg5[%c0_15, %c0_16] : memref<8x8xf32, #tpu.memory_space<vmem>>, vector<8x8xf32>
    tpu.vector_store %arg5[%c0_15, %c0_16], %27 {strides = array<i32>} : memref<8x8xf32, #tpu.memory_space<vmem>>, vector<8x8xf32>,
    %c0_17 = arith.constant 0 : index
    %c0_18 = arith.constant 0 : index
    %39 = vector.load %arg6[%c0_17, %c0_18] : memref<8x8xf32, #tpu.memory_space<vmem>>, vector<8x8xf32>
    tpu.vector_store %arg6[%c0_17, %c0_18], %37 {strides = array<i32>} : memref<8x8xf32, #tpu.memory_space<vmem>>, vector<8x8xf32>,
    %cst_19 = arith.constant 8.000000e+00 : f32
    %40 = vector.broadcast %cst_19 : f32 to vector<8x8xf32>
    %41 = arith.cmpf ogt, %27, %40 : vector<8x8xf32>
    %cst_20 = arith.constant 1.000000e+00 : f32
    %42 = vector.broadcast %cst_20 : f32 to vector<8x8xf32>
    %43 = arith.addf %27, %42 : vector<8x8xf32>
    %44 = arith.mulf %27, %43 : vector<8x8xf32>
    %cst_21 = arith.constant 2.000000e+00 : f32
    %45 = vector.broadcast %cst_21 : f32 to vector<8x8xf32>
    %46 = arith.addf %27, %45 : vector<8x8xf32>
    %47 = arith.mulf %44, %46 : vector<8x8xf32>
    %cst_22 = arith.constant 3.000000e+00 : f32
    %48 = vector.broadcast %cst_22 : f32 to vector<8x8xf32>
    %49 = arith.addf %27, %48 : vector<8x8xf32>
    %50 = arith.mulf %47, %49 : vector<8x8xf32>
    %cst_23 = arith.constant 4.000000e+00 : f32
    %51 = vector.broadcast %cst_23 : f32 to vector<8x8xf32>
    %52 = arith.addf %27, %51 : vector<8x8xf32>
    %53 = arith.mulf %50, %52 : vector<8x8xf32>
    %cst_24 = arith.constant 5.000000e+00 : f32
    %54 = vector.broadcast %cst_24 : f32 to vector<8x8xf32>
    %55 = arith.addf %27, %54 : vector<8x8xf32>
    %56 = arith.mulf %53, %55 : vector<8x8xf32>
    %cst_25 = arith.constant 6.000000e+00 : f32
    %57 = vector.broadcast %cst_25 : f32 to vector<8x8xf32>
    %58 = arith.mulf %57, %27 : vector<8x8xf32>
    %cst_26 = arith.constant 7.500000e+01 : f32
    %59 = vector.broadcast %cst_26 : f32 to vector<8x8xf32>
    %60 = arith.addf %58, %59 : vector<8x8xf32>
    %61 = arith.mulf %60, %27 : vector<8x8xf32>
    %cst_27 = arith.constant 3.400000e+02 : f32
    %62 = vector.broadcast %cst_27 : f32 to vector<8x8xf32>
    %63 = arith.addf %61, %62 : vector<8x8xf32>
    %64 = arith.mulf %63, %27 : vector<8x8xf32>
    %cst_28 = arith.constant 6.750000e+02 : f32
    %65 = vector.broadcast %cst_28 : f32 to vector<8x8xf32>
    %66 = arith.addf %64, %65 : vector<8x8xf32>
    %67 = arith.mulf %66, %27 : vector<8x8xf32>
    %cst_29 = arith.constant 5.480000e+02 : f32
    %68 = vector.broadcast %cst_29 : f32 to vector<8x8xf32>
    %69 = arith.addf %67, %68 : vector<8x8xf32>
    %70 = arith.mulf %69, %27 : vector<8x8xf32>
    %cst_30 = arith.constant 1.200000e+02 : f32
    %71 = vector.broadcast %cst_30 : f32 to vector<8x8xf32>
    %72 = arith.addf %70, %71 : vector<8x8xf32>
    %cst_31 = arith.constant 6.000000e+00 : f32
    %73 = vector.broadcast %cst_31 : f32 to vector<8x8xf32>
    %74 = arith.addf %27, %73 : vector<8x8xf32>
    %75 = arith.select %41, %27, %74 : vector<8x8xi1>, vector<8x8xf32>
    %cst_32 = arith.constant 1.000000e+00 : f32
    %76 = vector.broadcast %cst_32 : f32 to vector<8x8xf32>
    %77 = arith.divf %76, %75 : vector<8x8xf32>
    %78 = math.log %75 : vector<8x8xf32>
    %79 = arith.mulf %77, %77 : vector<8x8xf32>
    %cst_33 = arith.constant 5.95238118E-4 : f32
    %80 = vector.broadcast %cst_33 : f32 to vector<8x8xf32>
    %81 = arith.mulf %79, %80 : vector<8x8xf32>
    %cst_34 = arith.constant 7.93650805E-4 : f32
    %82 = vector.broadcast %cst_34 : f32 to vector<8x8xf32>
    %83 = arith.subf %82, %81 : vector<8x8xf32>
    %84 = arith.mulf %79, %83 : vector<8x8xf32>
    %cst_35 = arith.constant 0.00277777785 : f32
    %85 = vector.broadcast %cst_35 : f32 to vector<8x8xf32>
    %86 = arith.subf %85, %84 : vector<8x8xf32>
    %87 = arith.mulf %79, %86 : vector<8x8xf32>
    %cst_36 = arith.constant 0.0833333358 : f32
    %88 = vector.broadcast %cst_36 : f32 to vector<8x8xf32>
    %89 = arith.subf %88, %87 : vector<8x8xf32>
    %90 = arith.mulf %77, %89 : vector<8x8xf32>
    %cst_37 = arith.constant 5.000000e-01 : f32
    %91 = vector.broadcast %cst_37 : f32 to vector<8x8xf32>
    %92 = arith.subf %75, %91 : vector<8x8xf32>
    %93 = arith.mulf %92, %78 : vector<8x8xf32>
    %94 = arith.subf %93, %75 : vector<8x8xf32>
    %cst_38 = arith.constant 0.918938517 : f32
    %95 = vector.broadcast %cst_38 : f32 to vector<8x8xf32>
    %96 = arith.addf %94, %95 : vector<8x8xf32>
    %97 = arith.addf %96, %90 : vector<8x8xf32>
    %cst_39 = arith.constant 5.000000e-01 : f32
    %98 = vector.broadcast %cst_39 : f32 to vector<8x8xf32>
    %99 = arith.mulf %98, %77 : vector<8x8xf32>
    %100 = arith.subf %78, %99 : vector<8x8xf32>
    %cst_40 = arith.constant 0.0039682542 : f32
    %101 = vector.broadcast %cst_40 : f32 to vector<8x8xf32>
    %102 = arith.mulf %79, %101 : vector<8x8xf32>
    %cst_41 = arith.constant 0.00833333377 : f32
    %103 = vector.broadcast %cst_41 : f32 to vector<8x8xf32>
    %104 = arith.subf %103, %102 : vector<8x8xf32>
    %105 = arith.mulf %79, %104 : vector<8x8xf32>
    %cst_42 = arith.constant 0.0833333358 : f32
    %106 = vector.broadcast %cst_42 : f32 to vector<8x8xf32>
    %107 = arith.subf %106, %105 : vector<8x8xf32>
    %108 = arith.mulf %79, %107 : vector<8x8xf32>
    %109 = arith.subf %100, %108 : vector<8x8xf32>
    %110 = math.log %56 : vector<8x8xf32>
    %cst_43 = arith.constant 0.000000e+00 : f32
    %111 = vector.broadcast %cst_43 : f32 to vector<8x8xf32>
    %112 = arith.select %41, %111, %110 : vector<8x8xi1>, vector<8x8xf32>
    %113 = arith.subf %97, %112 : vector<8x8xf32>
    %114 = arith.divf %72, %56 : vector<8x8xf32>
    %cst_44 = arith.constant 0.000000e+00 : f32
    %115 = vector.broadcast %cst_44 : f32 to vector<8x8xf32>
    %116 = arith.select %41, %115, %114 : vector<8x8xi1>, vector<8x8xf32>
    %117 = arith.subf %109, %116 : vector<8x8xf32>
    %118 = math.log %37 : vector<8x8xf32>
    %119 = vector.broadcast %3 : vector<8x1xf32> to vector<8x8xf32>
    %120 = arith.mulf %119, %118 : vector<8x8xf32>
    %121 = vector.broadcast %5 : vector<8x1xf32> to vector<8x8xf32>
    %122 = arith.addf %120, %121 : vector<8x8xf32>
    %123 = arith.subf %122, %113 : vector<8x8xf32>
    %124 = vector.broadcast %3 : vector<8x1xf32> to vector<8x8xf32>
    %125 = arith.subf %27, %124 : vector<8x8xf32>
    %126 = arith.mulf %125, %117 : vector<8x8xf32>
    %127 = vector.broadcast %4 : vector<8x1xf32> to vector<8x8xf32>
    %128 = arith.subf %127, %37 : vector<8x8xf32>
    %129 = arith.divf %27, %37 : vector<8x8xf32>
    %130 = arith.mulf %128, %129 : vector<8x8xf32>
    %131 = arith.addf %123, %126 : vector<8x8xf32>
    %132 = arith.addf %131, %130 : vector<8x8xf32>
    %cst_45 = arith.constant dense<0.000000e+00> : vector<8xf32>
    %133 = vector.multi_reduction <add>, %132, %cst_45 [0] : vector<8x8xf32> to vector<8xf32>
    %134 = vector.shape_cast %133 : vector<8xf32> to vector<1x8xf32>
    %cst_46 = arith.constant 1.250000e-01 : f32
    %135 = vector.broadcast %cst_46 : f32 to vector<1x8xf32>
    %136 = arith.mulf %134, %135 : vector<1x8xf32>
    %c0_47 = arith.constant 0 : index
    %c0_48 = arith.constant 0 : index
    %137 = vector.load %arg7[%c0_47, %c0_48] : memref<1x8xf32, #tpu.memory_space<vmem>>, vector<1x8xf32>
    tpu.vector_store %arg7[%c0_47, %c0_48], %136 {strides = array<i32>} : memref<1x8xf32, #tpu.memory_space<vmem>>, vector<1x8xf32>,
    return
  }
  func.func @transform_0(%arg0: i32) -> (i32, i32) {
    %c0_i32 = arith.constant 0 : i32
    %c0_i32_0 = arith.constant 0 : i32
    return %c0_i32, %arg0 : i32, i32
  }
  func.func @transform_1(%arg0: i32) -> (i32, i32) {
    %c0_i32 = arith.constant 0 : i32
    %c0_i32_0 = arith.constant 0 : i32
    %c0_i32_1 = arith.constant 0 : i32
    return %c0_i32, %c0_i32_0 : i32, i32
  }
  func.func @transform_2(%arg0: i32) -> (i32, i32) {
    %c0_i32 = arith.constant 0 : i32
    %c0_i32_0 = arith.constant 0 : i32
    %c0_i32_1 = arith.constant 0 : i32
    return %c0_i32, %c0_i32_0 : i32, i32
  }
  func.func @transform_3(%arg0: i32) -> (i32, i32) {
    %c0_i32 = arith.constant 0 : i32
    %c0_i32_0 = arith.constant 0 : i32
    %c0_i32_1 = arith.constant 0 : i32
    return %c0_i32, %c0_i32_0 : i32, i32
  }
  func.func @transform_4(%arg0: i32) -> (i32, i32) {
    %c0_i32 = arith.constant 0 : i32
    %c0_i32_0 = arith.constant 0 : i32
    return %c0_i32, %arg0 : i32, i32
  }
  func.func @transform_5(%arg0: i32) -> (i32, i32) {
    %c0_i32 = arith.constant 0 : i32
    %c0_i32_0 = arith.constant 0 : i32
    return %c0_i32, %arg0 : i32, i32
  }
  func.func @transform_6(%arg0: i32) -> (i32, i32) {
    %c0_i32 = arith.constant 0 : i32
    %c0_i32_0 = arith.constant 0 : i32
    return %c0_i32, %arg0 : i32, i32
  }
}

</mosaic_0001>

<bundles_post_ra>
// kernel: tpu_custom_call.1
= control target key start
LH: loop header
LB: loop body
LE: loop exit
PB: predicated region body
PF: predicated region fallthrough
CT: control target
= control target key end

     0   :  { %12 = vsyncpa [#allocation3], 0  ;;  %v444_v2 = vmov 0   ;;  %s583_s0 = inlined_call_operand.vmem [shape: bf16[16,8], index: 0, kind: input, shape index: {}]   ;;  %s584_s1 = inlined_call_operand.vmem [shape: bf16[16,16], index: 1, kind: input, shape index: {}]   ;;  %s585_s2 = inlined_call_operand.vmem [shape: bf16[16,16], index: 2, kind: input, shape index: {}]   ;;  %s586_s3 = inlined_call_operand.vmem [shape: f32[56,1], index: 3, kind: input, shape index: {}]   ;;  %s587_s4 = inlined_call_operand.hbm [shape: f32[8,8], index: 4, kind: output, shape index: {0}]   ;;  %s588_s5 = inlined_call_operand.hbm [shape: f32[8,8], index: 5, kind: output, shape index: {1}]   ;;  %s589_s6 = inlined_call_operand.hbm [shape: f32[1,8], index: 6, kind: output, shape index: {2}]  }
   0x1   :  { %v23_v0 = vld [vmem:[%s586_s3] sm:$0xff]  ;;  %345 = vset.pattern.permute.xlu0 %v444_v2  ;;  %346 = vset.pattern.permute.xlu1 %v444_v2 }
   0x2   :  { %v339_v1 = vld [vmem:[%s583_s0] sm:$0xff] }
   0x3   :  { %v338_v3 = vld [vmem:[%s584_s1] sm:$0xff] }
   0x4   :  { %13 = vsyncpa [#allocation5], 0  ;;  %36 = vperm.xlu0 %345, %v23_v0   ;;  %66 = vmatpush.bf16.msra.mxu0 %v339_v1  ;;  %vm55_vm0 = vcmask 130048   ;;  %v24_v4 = vld [vmem:[%s586_s3 + $0x8] sm:$0xff]  ;;  %v25_v6 = vld [vmem:[%s586_s3 + $0x10] sm:$0xff]  ;;  %s283_s17 = sshll.u32 %s587_s4, 4  ;;  %s284_s17 = int_to_ptr.hbm [resolvable:$true] %s283_s17 }
   0x5   :  { %347 = vset.pattern.permute.xlu2 %v444_v2  ;;  %v28_v5 = vld [vmem:[%s586_s3 + $0x28] sm:$0xff]  ;;  %v27_v7 = vld [vmem:[%s586_s3 + $0x20] sm:$0xff]  ;;  %80 = vperm.xlu1 %346, %v25_v6   ;;  %v26_v8 = vld [vmem:[%s586_s3 + $0x18] sm:$0xff]  ;;  %vm140_vm3 = vcmask 64512   ;;  %s446_s4 = smov [#allocation4]   ;;  %s294_s21 = sshll.u32 %s588_s5, 4  ;;  %s295_s21 = int_to_ptr.hbm [resolvable:$true] %s294_s21 }
   0x6   :  { %229 = vperm.xlu2 %347, %v27_v7   ;;  %v29_v9 = vld [vmem:[%s586_s3 + $0x30] sm:$0xff]  ;;  %v340_v19 = vld [vmem:[%s585_s2] sm:$0xff]  ;;  %s445_s2 = smov [#allocation2]   ;;  %s292_s18 = sshll.u32 %s446_s4, 4  ;;  %s293_s18 = int_to_ptr.vmem [resolvable:$true] %s292_s18 }
   0x7   :  { %331 = vmatmul.msk.bf16.vlgmr.msra.gmra.mxu0 %vm55_vm0, %v338_v3  ;;  %s281_s3 = sshll.u32 %s445_s2, 4  ;;  %s447_s5 = smov [#allocation6]   ;;  %s282_s3 = int_to_ptr.vmem [resolvable:$true] %s281_s3 }
   0x8   :  { %s303_s22 = sshll.u32 %s447_s5, 4  ;;  %s305_s25 = sshll.u32 %s589_s6, 4  ;;  %s304_s22 = int_to_ptr.vmem [resolvable:$true] %s303_s22  ;;  %s306_s25 = int_to_ptr.hbm [resolvable:$true] %s305_s25 }
   0xc   :  { %41 = vperm.xlu0 %345, %v24_v4  }
   0xd   :  { %85 = vperm.xlu1 %346, %v26_v8  }
   0xe   :  { %235 = vperm.xlu2 %347, %v29_v9  }
  0x14   :  { %244 = vperm.xlu0 %345, %v28_v5  }
  0x76   :  { %v37_v10 = vpop.permute.xlu0 %36 }
  0x77   :  { %v81_v20 = vpop.permute.xlu1 %80 }
  0x7e   :  { %v42_v13 = vpop.permute.xlu0 %41 }
  0x7f   :  { %v86_v25 = vpop.permute.xlu1 %85 }
  0x84   :  { %v68_v11 = vpop.f32.mrf.mxu0 }
  0x85   :  { %v69_v12 = vadd.f32 %v68_v11, %v37_v10 }
  0x87   :  { %v73_v16 = vmax.f32 %v69_v12, 0.0 }
  0x8c   :  { %v70_v14 = vpop.f32.mrf.mxu0 }
  0x8d   :  { %v71_v15 = vadd.f32 %v70_v14, %v42_v13 }
  0x8f   :  { %v74_v17 = vmax.f32 %v71_v15, 0.0 }
  0x91   :  { %v75_v18 = vpack.c.bf16 %v74_v17, %v73_v16 }
  0x93   :  { %103 = vmatpush.bf16.msra.mxu1 %v75_v18 }
  0x96   :  { %336 = vmatmul.msk.bf16.vlgmr.msra.gmra.mxu1 %vm55_vm0, %v340_v19 }
 0x113   :  { %v105_v21 = vpop.f32.mrf.mxu1 }
 0x114   :  { %v106_v22 = vadd.f32 %v105_v21, %v81_v20 }
 0x116   :  { %v111_v23 = vmin.f32 %v106_v22, 20.0  ;;  %vm110_vm2 = vcmp.gt.f32.partialorder %v106_v22, 20.0 }
 0x118   :  { %v112_v24 = vmul.f32 1.442695, %v111_v23 }
 0x11a   :  { %348 = vpow2.f32 %v112_v24 }
 0x11b   :  { %v107_v26 = vpop.f32.mrf.mxu1 }
 0x11c   :  { %v108_v27 = vadd.f32 %v107_v26, %v86_v25 }
 0x11e   :  { %v126_v28 = vmin.f32 %v108_v27, 20.0  ;;  %vm125_vm5 = vcmp.gt.f32.partialorder %v108_v27, 20.0 }
 0x120   :  { %v349_v29 = vpop.eup %348  ;;  %v127_v30 = vmul.f32 1.442695, %v126_v28 }
 0x121   :  { %v114_v31 = vadd.f32 1.0, %v349_v29  ;;  %v117_v32 = vmul.f32 -0.5, %v349_v29  ;;  %v120_v34 = vand.u32 2147483647, %v349_v29 }
 0x122   :  { %350 = vpow2.f32 %v127_v30 }
 0x123   :  { %352 = vlog2.f32 %v114_v31  ;;  %v118_v33 = vadd.f32 1.0, %v117_v32  ;;  %vm121_vm1 = vcmp.lt.f32.partialorder %v120_v34, 0.0004427343 }
 0x125   :  { %v119_v39 = vmul.f32 %v349_v29, %v118_v33 }
 0x128   :  { %v351_v35 = vpop.eup %350 }
 0x129   :  { %v353_v36 = vpop.eup %352  ;;  %v129_v37 = vadd.f32 1.0, %v351_v35  ;;  %v132_v40 = vmul.f32 -0.5, %v351_v35  ;;  %v135_v45 = vand.u32 2147483647, %v351_v35 }
 0x12a   :  { %v116_v38 = vmul.f32 0.6931472, %v353_v36 }
 0x12b   :  { %354 = vlog2.f32 %v129_v37  ;;  %v133_v44 = vadd.f32 1.0, %v132_v40  ;;  %vm136_vm6 = vcmp.lt.f32.partialorder %v135_v45, 0.0004427343 }
 0x12c   :  { %v122_v41 = vsel %vm121_vm1, %v119_v39, %v116_v38 }
 0x12d   :  { %v123_v42 = vsel %vm110_vm2, %v106_v22, %v122_v41  ;;  %v134_v51 = vmul.f32 %v351_v35, %v133_v44 }
 0x12e   :  { %v518_v43 = vmax.f32 %v123_v42, 1e-30 }
 0x130   :  { %vm143_vm4 = vcmp.gt.f32.partialorder %v518_v43, 8.0  ;;  %v144_v46 = vadd.f32 1.0, %v518_v43  ;;  %141 = vst.msk [vmem:[#allocation2] sm:$0xff] %vm140_vm3, %v518_v43  ;;  %v154_v48 = vmul.f32 6.0, %v518_v43  ;;  %v164_v49 = vadd.f32 6.0, %v518_v43 }
 0x131   :  { %v355_v47 = vpop.eup %354  ;;  %286 = dma.vmem_to_hbm [thread:$0]  %s282_s3, 128, %s284_s17, [#allocation3]   ;;  %v146_v53 = vadd.f32 2.0, %v518_v43  ;;  %v148_v58 = vadd.f32 3.0, %v518_v43  ;;  %v150_v63 = vadd.f32 4.0, %v518_v43  ;;  %v152_v2 = vadd.f32 5.0, %v518_v43 }
 0x132   :  { %v131_v50 = vmul.f32 0.6931472, %v355_v47  ;;  %v145_v52 = vmul.f32 %v144_v46, %v518_v43  ;;  %v155_v54 = vadd.f32 75.0, %v154_v48  ;;  %v531_v55 = vsel %vm143_vm4, %v518_v43, %v164_v49  ;;  %v230_v46 = vpop.permute.xlu2 %229 }
 0x133   :  { %356 = vrcp.f32 %v531_v55  ;;  %v177_v10 = vand.u32 2147483648, %v531_v55  ;;  %v175_v12 = vand.u32 2147483647, %v531_v55  ;;  %vm171_vm8 = vweird.f32 %v531_v55 }
 0x134   :  { %v137_v56 = vsel %vm136_vm6, %v134_v51, %v131_v50  ;;  %v147_v57 = vmul.f32 %v146_v53, %v145_v52  ;;  %v156_v60 = vmul.f32 %v155_v54, %v518_v43  ;;  %v337_v32 = vadd.f32 -0.5, %v531_v55 }
 0x135   :  { %v138_v59 = vsel %vm125_vm5, %v108_v27, %v137_v56  ;;  %v178_v17 = vor.u32 1.1754944e-38, %v177_v10  ;;  %vm176_vm10 = vcmp.eq.f32.partialorder %v175_v12, 8.507059e+37 }
 0x136   :  { %v539_v61 = vmax.f32 %v138_v59, 1e-30  ;;  %v149_v62 = vmul.f32 %v148_v58, %v147_v57  ;;  %v157_v0 = vadd.f32 340.0, %v156_v60 }
 0x138   :  { %358 = vrcp.f32 %v539_v61  ;;  %v151_v1 = vmul.f32 %v150_v63, %v149_v62  ;;  %142 = vst.msk [vmem:[#allocation4] sm:$0xff] %vm140_vm3, %v539_v61  ;;  %v158_v5 = vmul.f32 %v157_v0, %v518_v43  ;;  %vm253_vm15 = vweird.f32 %v539_v61 }
 0x139   :  { %297 = dma.vmem_to_hbm [thread:$0]  %s293_s18, 128, %s295_s21, [#allocation5]   ;;  %v357_v3 = vpop.eup %356  ;;  %v257_v54 = vand.u32 2147483647, %v539_v61  ;;  %v259_v56 = vand.u32 2147483648, %v539_v61 }
 0x13a   :  { %v153_v4 = vmul.f32 %v152_v2, %v151_v1  ;;  %v167_v6 = vmul.f32 %v357_v3, %v531_v55  ;;  %v159_v9 = vadd.f32 675.0, %v158_v5  ;;  %vm172_vm7 = vweird.f32 %v357_v3 }
 0x13b   :  { %vm173_vm9 = vmor %vm171_vm8, %vm172_vm7  ;;  %vm258_vm2 = vcmp.eq.f32.partialorder %v257_v54, 8.507059e+37 }
 0x13c   :  { %360 = vrcp.f32 %v153_v4  ;;  %v168_v7 = vsub.f32 1.0, %v167_v6  ;;  %v160_v16 = vmul.f32 %v159_v9, %v518_v43  ;;  %v219_v27 = vand.u32 2147483648, %v153_v4 }
 0x13d   :  { %362 = vlog2.f32 %v531_v55  ;;  %vm213_vm12 = vweird.f32 %v153_v4  ;;  %v217_v31 = vand.u32 2147483647, %v153_v4 }
 0x13e   :  { %v549_v8 = vpop.eup %358  ;;  %v169_v11 = vmul.f32 %v357_v3, %v168_v7  ;;  %364 = vlog2.f32 %v539_v61  ;;  %v161_v25 = vadd.f32 548.0, %v160_v16  ;;  %v220_v38 = vor.u32 1.1754944e-38, %v219_v27  ;;  %v245_v16 = vpop.permute.xlu0 %244 }
 0x13f   :  { %v249_v14 = vmul.f32 %v549_v8, %v539_v61  ;;  %366 = vlog2.f32 %v153_v4  ;;  %vm218_vm14 = vcmp.eq.f32.partialorder %v217_v31, 8.507059e+37  ;;  %vm254_vm0 = vweird.f32 %v549_v8 }
 0x140   :  { %v170_v13 = vadd.f32 %v357_v3, %v169_v11  ;;  %v162_v37 = vmul.f32 %v161_v25, %v518_v43  ;;  %vm255_vm1 = vmor %vm253_vm15, %vm254_vm0 }
 0x141   :  { %v250_v24 = vsub.f32 1.0, %v249_v14 }
 0x142   :  { %v361_v15 = vpop.eup %360  ;;  %v174_v19 = vsel %vm173_vm9, %v357_v3, %v170_v13  ;;  %v163_v52 = vadd.f32 120.0, %v162_v37  ;;  %v260_v3 = vor.u32 1.1754944e-38, %v259_v56  ;;  %v240_v13 = vsub.f32 %v518_v43, %v230_v46 }
 0x143   :  { %v363_v18 = vpop.eup %362  ;;  %v209_v20 = vmul.f32 %v361_v15, %v153_v4  ;;  %v179_v21 = vsel %vm176_vm10, %v178_v17, %v174_v19  ;;  %vm214_vm11 = vweird.f32 %v361_v15  ;;  %v251_v36 = vmul.f32 %v549_v8, %v250_v24 }
 0x144   :  { %v183_v22 = vmul.f32 %v179_v21, %v179_v21  ;;  %v182_v26 = vmul.f32 0.6931472, %v363_v18  ;;  %vm215_vm13 = vmor %vm213_vm12, %vm214_vm11  ;;  %v365_v40 = vpop.eup %364  ;;  %v196_v41 = vmul.f32 0.5, %v179_v21  ;;  %v247_v19 = vsub.f32 %v245_v16, %v539_v61 }
 0x145   :  { %v210_v23 = vsub.f32 1.0, %v209_v20  ;;  %v252_v50 = vadd.f32 %v549_v8, %v251_v36  ;;  %v367_v51 = vpop.eup %366  ;;  %v226_v53 = vmul.f32 0.6931472, %v365_v40 }
 0x146   :  { %v198_v28 = vmul.f32 0.003968254, %v183_v22  ;;  %v184_v30 = vmul.f32 0.0005952381, %v183_v22  ;;  %v192_v39 = vmul.f32 %v337_v32, %v182_v26  ;;  %v197_v57 = vsub.f32 %v182_v26, %v196_v41 }
 0x147   :  { %v211_v29 = vmul.f32 %v361_v15, %v210_v23  ;;  %v256_v1 = vsel %vm255_vm1, %v549_v8, %v252_v50  ;;  %v205_v2 = vmul.f32 0.6931472, %v367_v51  ;;  %v232_v4 = vmul.f32 %v230_v46, %v226_v53 }
 0x148   :  { %v199_v33 = vsub.f32 0.008333334, %v198_v28  ;;  %v185_v35 = vsub.f32 0.0007936508, %v184_v30  ;;  %v193_v60 = vsub.f32 %v192_v39, %v531_v55  ;;  %v236_v55 = vpop.permute.xlu2 %235  ;;  %v261_v9 = vsel %vm258_vm2, %v260_v3, %v256_v1 }
 0x149   :  { %v212_v34 = vadd.f32 %v361_v15, %v211_v29  ;;  %v206_v12 = vsel %vm143_vm4, 0.0, %v205_v2  ;;  %v238_v8 = vadd.f32 %v236_v55, %v232_v4 }
 0x14a   :  { %v200_v42 = vmul.f32 %v199_v33, %v183_v22  ;;  %v186_v45 = vmul.f32 %v185_v35, %v183_v22  ;;  %v194_v6 = vadd.f32 0.9189385, %v193_v60 }
 0x14b   :  { %v216_v44 = vsel %vm215_vm13, %v361_v15, %v212_v34  ;;  %v262_v15 = vmul.f32 %v261_v9, %v518_v43 }
 0x14c   :  { %v201_v47 = vsub.f32 0.083333336, %v200_v42  ;;  %v221_v48 = vsel %vm218_vm14, %v220_v38, %v216_v44  ;;  %v187_v49 = vsub.f32 0.0027777778, %v186_v45 }
 0x14d   :  { %v222_v62 = vmul.f32 %v221_v48, %v163_v52  ;;  %v263_v20 = vmul.f32 %v262_v15, %v247_v19 }
 0x14e   :  { %v202_v58 = vmul.f32 %v201_v47, %v183_v22  ;;  %v188_v59 = vmul.f32 %v187_v49, %v183_v22 }
 0x14f   :  { %v223_v7 = vsel %vm143_vm4, 0.0, %v222_v62  ;;  %vm274_vm4 = vcmask 57344  }
 0x150   :  { %v203_v63 = vsub.f32 %v197_v57, %v202_v58  ;;  %v189_v0 = vsub.f32 0.083333336, %v188_v59 }
 0x152   :  { %v190_v5 = vmul.f32 %v189_v0, %v179_v21  ;;  %v224_v10 = vsub.f32 %v203_v63, %v223_v7 }
 0x154   :  { %v195_v11 = vadd.f32 %v194_v6, %v190_v5  ;;  %v241_v17 = vmul.f32 %v240_v13, %v224_v10 }
 0x156   :  { %v207_v14 = vsub.f32 %v195_v11, %v206_v12 }
 0x158   :  { %v239_v18 = vsub.f32 %v238_v8, %v207_v14 }
 0x15a   :  { %v264_v21 = vadd.f32 %v241_v17, %v239_v18 }
 0x15c   :  { %v265_v22 = vadd.f32 %v264_v21, %v263_v20 }
 0x15e   :  { %v266_v23 = vsel %vm140_vm3, %v265_v22, 0.0 }
 0x15f   :  { %v267_v24 = vrot.slane %v266_v23, 4 }
 0x161   :  { %v268_v25 = vadd.f32 %v267_v24, %v266_v23 }
 0x163   :  { %v269_v26 = vrot.slane %v268_v25, 2 }
 0x165   :  { %v270_v27 = vadd.f32 %v269_v26, %v268_v25 }
 0x167   :  { %v271_v28 = vrot.slane %v270_v27, 1 }
 0x169   :  { %v272_v43 = vadd.f32 %v271_v28, %v270_v27 }
 0x16b   :  { %v273_v29 = vmul.f32 0.125, %v272_v43 }
 0x16d   :  { %275 = vst.msk [vmem:[#allocation6] sm:$0x1] %vm274_vm4, %v273_v29 }
 0x16e   :  { %308 = dma.vmem_to_hbm [thread:$0]  %s304_s22, 16, %s306_s25, [#allocation5]  }
 0x16f   :  { %440 = dma.done.wait [#allocation3], 128  }
 0x170   :  { %441 = vsyncadd [#allocation3], 4294967168 }
 0x171   :  { %442 = dma.done.wait [#allocation5], 144  }
 0x172   :  { %443 = vsyncadd [#allocation5], 4294967152 }
 0x173   :  { %321 = vsyncpa [#allocation3], 1 }
 0x174   :  { %322 = vsyncpa [#allocation5], 1 }

</bundles_post_ra>
